<compile_context>
chip_gen: v7x
topology: tpu7x:2x2x1
jax: 0.10.0
libtpu: 0.0.40
codegen_flags: <defaults>
</compile_context>

<pallas_src>
import functools

import jax
import jax.numpy as jnp
from jax.experimental import pallas as pl
from jax.experimental.pallas import tpu as pltpu


# ---------------------------------------------------------------------------
# Chip-generation heuristics
# ---------------------------------------------------------------------------
def _tpu_generation() -> str:
    try:
        kind = jax.devices()[0].device_kind.lower()
    except Exception:
        return "unknown"
    if "v5 lite" in kind or "v5lite" in kind or "v5e" in kind:
        return "v5e"
    if "v6" in kind:
        return "v6e"
    if "v7" in kind:
        return "v7x"
    return "unknown"


# Per-destination-row contiguous byte threshold below which the strided
# cat_dim=1 HBM->HBM DMA degenerates into per-row descriptors and we stage
# through VMEM instead.  Faster HBM => fixed descriptor cost is relatively
# more expensive => higher threshold.
_STAGE_ROW_BYTES_THRESHOLD = {"v5e": 256, "v6e": 512, "v7x": 1024, "unknown": 512}

# VMEM budget for the staged path (double-buffered inputs + output).
_STAGE_VMEM_BUDGET = {
    "v5e": 96 << 20,
    "v6e": 96 << 20,
    "v7x": 24 << 20,  # 64 MiB physical / 32 MiB scoped on v7x
    "unknown": 24 << 20,
}

# Direct-DMA path: split a shard's copy into sub-DMAs above this size so the
# DMA engines have more outstanding descriptors while the tail drains.
_DEFAULT_SPLIT_BYTES = 2 << 20


def _row_chunks(n_rows: int, n_splits: int):
    """Static row-range partition [(r0, r1), ...] of n_rows into n_splits."""
    n_splits = max(1, min(n_splits, n_rows))
    base, rem = divmod(n_rows, n_splits)
    out, start = [], 0
    for j in range(n_splits):
        sz = base + (1 if j < rem else 0)
        out.append((start, start + sz))
        start += sz
    return out


# ---------------------------------------------------------------------------
# Path 1: VMEM-staged, row-tiled concat for cat_dim=1 with small D_i
# ---------------------------------------------------------------------------
def _staged_cat1_kernel(*refs, n_inputs: int, cat_sizes):
    """Each shard's (TILE_B, D_i) tile is written into its column slice of the
    lane-dense (TILE_B, cat_total) output tile.  Both the HBM reads and the
    HBM writeback are fully dense DMAs generated by the BlockSpec pipeline."""
    in_refs = refs[:n_inputs]
    out_ref = refs[n_inputs]
    off = 0
    for i in range(n_inputs):
        size = cat_sizes[i]
        out_ref[:, off:off + size] = in_refs[i][...]
        off += size


def _merge_cat1_staged(tensors, cat_sizes, cat_total, non_cat_size, dtype,
                       total_in_bytes, gen):
    itemsize = jnp.dtype(dtype).itemsize
    budget = _STAGE_VMEM_BUDGET[gen]

    # Double-buffered inputs (sum_i D_i = cat_total) + double-buffered output
    # => ~4 * TILE_B * cat_total * itemsize bytes of VMEM.
    per_row_bytes = max(4 * cat_total * itemsize, 1)
    tile_b = budget // per_row_bytes
    tile_b = max(8, min(int(tile_b), 2048))
    if tile_b >= non_cat_size:
        tile_b = non_cat_size            # full dim: always a legal block shape
    elif tile_b >= 32:
        tile_b = (tile_b // 32) * 32     # safe sublane multiple for any dtype
    else:
        tile_b = max(8, (tile_b // 8) * 8)

    grid = (pl.cdiv(non_cat_size, tile_b),)
    vmem_needed = 4 * tile_b * cat_total * itemsize
    vmem_limit = int(min(max(vmem_needed + (4 << 20), 32 << 20), 100 << 20))

    kernel = functools.partial(
        _staged_cat1_kernel, n_inputs=len(tensors), cat_sizes=tuple(cat_sizes))

    in_specs = [pl.BlockSpec((tile_b, d), lambda r: (r, 0)) for d in cat_sizes]
    out_spec = pl.BlockSpec((tile_b, cat_total), lambda r: (r, 0))

    return pl.pallas_call(
        kernel,
        out_shape=jax.ShapeDtypeStruct((non_cat_size, cat_total), dtype),
        grid=grid,
        in_specs=in_specs,
        out_specs=out_spec,
        compiler_params=pltpu.CompilerParams(
            dimension_semantics=("parallel",),   # split row tiles across TCs (v7x)
            vmem_limit_bytes=vmem_limit,
        ),
        cost_estimate=pl.CostEstimate(
            flops=0, transcendentals=0, bytes_accessed=2 * total_in_bytes),
    )(*tensors)


# ---------------------------------------------------------------------------
# Path 2: direct HBM->HBM DMA concat (cat_dim=0, or cat_dim=1 with wide D_i)
# ---------------------------------------------------------------------------
def _direct_dma_kernel(*refs, n_inputs: int, cat_dim: int, cat_sizes, offsets,
                       order, chunks):
    """Pure-DMA concatenation: every sub-copy is started before any wait so
    the DMA engines overlap them; no bytes pass through vregs or VMEM."""
    in_refs = refs[:n_inputs]
    out_ref = refs[n_inputs]
    sems = refs[n_inputs + 1]

    copies = []
    sem_i = 0
    for i in order:                      # largest shards issued first
        src = in_refs[i]
        off_i = offsets[i]
        size_i = cat_sizes[i]
        n_rows = src.shape[0]
        for (r0, r1) in chunks[i]:
            whole = (r0 == 0 and r1 == n_rows)
            s = src if whole else src.at[r0:r1, :]
            if cat_dim == 0:
                dst = out_ref.at[off_i + r0:off_i + r1, :]
            else:
                dst = out_ref.at[r0:r1, off_i:off_i + size_i]
            cp = pltpu.make_async_copy(s, dst, sems.at[sem_i])
            cp.start()
            copies.append(cp)
            sem_i += 1

    for cp in copies:
        cp.wait()


def _merge_direct_dma(tensors, cat_dim, cat_sizes, out_shape, dtype,
                      total_in_bytes, split_bytes):
    n = len(tensors)
    itemsize = jnp.dtype(dtype).itemsize

    offsets, off = [], 0
    for s in cat_sizes:
        offsets.append(off)
        off += s

    shard_bytes = [int(t.size) * itemsize for t in tensors]
    chunks = []
    for t, nb in zip(tensors, shard_bytes):
        n_rows = int(t.shape[0])
        if nb >= 4 * split_bytes:
            n_sub = 4
        elif nb >= split_bytes:
            n_sub = 2
        else:
            n_sub = 1
        chunks.append(tuple(_row_chunks(n_rows, n_sub)))

    order = tuple(sorted(range(n), key=lambda i: shard_bytes[i], reverse=True))
    n_copies = sum(len(c) for c in chunks)

    kernel = functools.partial(
        _direct_dma_kernel, n_inputs=n, cat_dim=cat_dim,
        cat_sizes=tuple(cat_sizes), offsets=tuple(offsets),
        order=order, chunks=tuple(chunks))

    return pl.pallas_call(
        kernel,
        out_shape=jax.ShapeDtypeStruct(out_shape, dtype),
        # Inputs and output stay in HBM; the kernel drives the DMAs itself.
        in_specs=[pl.BlockSpec(memory_space=pl.ANY) for _ in tensors],
        out_specs=pl.BlockSpec(memory_space=pl.ANY),
        scratch_shapes=[pltpu.SemaphoreType.DMA((n_copies,))],
        cost_estimate=pl.CostEstimate(
            flops=0, transcendentals=0, bytes_accessed=2 * total_in_bytes),
    )(*tensors)


# ---------------------------------------------------------------------------
# Public wrapper (dispatch)
# ---------------------------------------------------------------------------
def embeddings_all_to_one(tensors, cat_dim: int, *,
                          split_bytes: int = _DEFAULT_SPLIT_BYTES,
                          _force_path=None):
    """Merge a list of 2-D embedding shards along `cat_dim` on one device.

    Equivalent to torch.ops.fbgemm.merge_pooled_embeddings(tensors, ..., cat_dim)
    i.e. torch.cat(tensors, dim=cat_dim) materialized on the target device.
    """
    assert cat_dim in (0, 1)
    world_size = len(tensors)
    assert world_size >= 1

    dtype = tensors[0].dtype
    non_cat_dim = 1 - cat_dim
    non_cat_size = int(tensors[0].shape[non_cat_dim])
    for t in tensors:
        assert t.ndim == 2
        assert t.dtype == dtype
        assert int(t.shape[non_cat_dim]) == non_cat_size

    cat_sizes = tuple(int(t.shape[cat_dim]) for t in tensors)
    cat_total = sum(cat_sizes)
    out_shape = ((non_cat_size, cat_total) if cat_dim == 1
                 else (cat_total, non_cat_size))

    itemsize = jnp.dtype(dtype).itemsize
    total_in_bytes = sum(int(t.size) * itemsize for t in tensors)
    gen = _tpu_generation()

    # Path selection.  For cat_dim=1 the direct-DMA destination slice is
    # strided in HBM (per-row contiguous run of only D_i*itemsize bytes), so
    # below a burst-sized threshold (generation dependent) — or with very many
    # tiny shards — we coalesce through VMEM.  For cat_dim=0 every shard is a
    # fully contiguous output slab, so direct DMA is already near roofline.
    use_staged = False
    if cat_dim == 1:
        min_row_bytes = min(cat_sizes) * itemsize
        use_staged = (min_row_bytes < _STAGE_ROW_BYTES_THRESHOLD[gen]
                      or world_size >= 32)
    if _force_path == "staged":
        use_staged = True
    elif _force_path == "direct":
        use_staged = False

    if use_staged and cat_dim == 1:
        return _merge_cat1_staged(tensors, cat_sizes, cat_total, non_cat_size,
                                  dtype, total_in_bytes, gen)
    return _merge_direct_dma(tensors, cat_dim, cat_sizes, out_shape, dtype,
                             total_in_bytes, split_bytes)


if __name__ == "__main__":
    key = jax.random.PRNGKey(0)
    world_size = 4
    batch = 16
    keys = jax.random.split(key, 3 * world_size)

    # ---- pooled embeddings, cat_dim=1, small unequal D_i, bf16 ------------
    # Exercises the VMEM-staged row-tiled path (strided-destination case).
    dims_small = (64, 96, 32, 128)
    pooled_small = [
        jax.random.normal(keys[i], (batch, dims_small[i]), dtype=jnp.bfloat16)
        for i in range(world_size)
    ]
    out1 = jax.block_until_ready(embeddings_all_to_one(pooled_small, cat_dim=1))
    ref1 = jnp.concatenate(pooled_small, axis=1)
    assert out1.shape == (batch, sum(dims_small))
    assert jnp.array_equal(out1, ref1)

    # ---- pooled embeddings, cat_dim=1, wide D_i, fp32 ----------------------
    # Heuristic path (direct DMA on v5e/v6e, staged on v7x).
    dims_big = (256, 384, 256, 128)
    pooled_big = [
        jax.random.normal(keys[world_size + i], (batch, dims_big[i]),
                          dtype=jnp.float32)
        for i in range(world_size)
    ]
    out2 = jax.block_until_ready(embeddings_all_to_one(pooled_big, cat_dim=1))
    ref2 = jnp.concatenate(pooled_big, axis=1)
    assert out2.shape == (batch, sum(dims_big))
    assert jnp.array_equal(out2, ref2)

    # Force the direct HBM->HBM DMA cat_dim=1 path on every generation too.
    out2d = jax.block_until_ready(
        embeddings_all_to_one(pooled_big, cat_dim=1, _force_path="direct"))
    assert jnp.array_equal(out2d, ref2)

    # ---- sequence embeddings, cat_dim=0, unequal row counts ----------------
    # split_bytes tiny to also exercise the multi-sub-DMA issue path.
    rows = (16, 8, 24, 16)
    emb_dim = 128
    seq_shards = [
        jax.random.normal(keys[2 * world_size + i], (rows[i], emb_dim),
                          dtype=jnp.float32)
        for i in range(world_size)
    ]
    out3 = jax.block_until_ready(
        embeddings_all_to_one(seq_shards, cat_dim=0, split_bytes=1024))
    ref3 = jnp.concatenate(seq_shards, axis=0)
    assert out3.shape == (sum(rows), emb_dim)
    assert jnp.array_equal(out3, ref3)

    print("KERNEL_OK")
</pallas_src>

<mosaic_0001>
module attributes {stable_mosaic.version = 11 : i64} {
  func.func @_staged_cat1_kernel(%arg0: i32, %arg1: memref<16x64xbf16, #tpu.memory_space<vmem>>, %arg2: memref<16x96xbf16, #tpu.memory_space<vmem>>, %arg3: memref<16x32xbf16, #tpu.memory_space<vmem>>, %arg4: memref<16x128xbf16, #tpu.memory_space<vmem>>, %arg5: memref<16x320xbf16, #tpu.memory_space<vmem>>) attributes {dimension_semantics = [#tpu.dimension_semantics<parallel>], iteration_bounds = array<i64: 1>, scalar_prefetch = 0 : i64, scratch_operands = 0 : i64, tpu.core_type = #tpu.core_type<tc>, window_params = [{transform_indices = @transform_0, window_bounds = array<i64: 16, 64>}, {transform_indices = @transform_1, window_bounds = array<i64: 16, 96>}, {transform_indices = @transform_2, window_bounds = array<i64: 16, 32>}, {transform_indices = @transform_3, window_bounds = array<i64: 16, 128>}, {transform_indices = @transform_4, window_bounds = array<i64: 16, 320>}]} {
    %c0 = arith.constant 0 : index
    %c0_0 = arith.constant 0 : index
    %0 = vector.load %arg1[%c0, %c0_0] : memref<16x64xbf16, #tpu.memory_space<vmem>>, vector<16x64xbf16>
    %c0_1 = arith.constant 0 : index
    %c0_2 = arith.constant 0 : index
    %1 = vector.load %arg5[%c0_1, %c0_2] : memref<16x320xbf16, #tpu.memory_space<vmem>>, vector<16x64xbf16>
    tpu.vector_store %arg5[%c0_1, %c0_2], %0 {strides = array<i32>} : memref<16x320xbf16, #tpu.memory_space<vmem>>, vector<16x64xbf16>,
    %c0_3 = arith.constant 0 : index
    %c0_4 = arith.constant 0 : index
    %2 = vector.load %arg2[%c0_3, %c0_4] : memref<16x96xbf16, #tpu.memory_space<vmem>>, vector<16x96xbf16>
    %c0_5 = arith.constant 0 : index
    %c64 = arith.constant 64 : index
    %3 = vector.load %arg5[%c0_5, %c64] : memref<16x320xbf16, #tpu.memory_space<vmem>>, vector<16x96xbf16>
    tpu.vector_store %arg5[%c0_5, %c64], %2 {strides = array<i32>} : memref<16x320xbf16, #tpu.memory_space<vmem>>, vector<16x96xbf16>,
    %c0_6 = arith.constant 0 : index
    %c0_7 = arith.constant 0 : index
    %4 = vector.load %arg3[%c0_6, %c0_7] : memref<16x32xbf16, #tpu.memory_space<vmem>>, vector<16x32xbf16>
    %c0_8 = arith.constant 0 : index
    %c160 = arith.constant 160 : index
    %5 = vector.load %arg5[%c0_8, %c160] : memref<16x320xbf16, #tpu.memory_space<vmem>>, vector<16x32xbf16>
    tpu.vector_store %arg5[%c0_8, %c160], %4 {strides = array<i32>} : memref<16x320xbf16, #tpu.memory_space<vmem>>, vector<16x32xbf16>,
    %c0_9 = arith.constant 0 : index
    %c0_10 = arith.constant 0 : index
    %6 = vector.load %arg4[%c0_9, %c0_10] : memref<16x128xbf16, #tpu.memory_space<vmem>>, vector<16x128xbf16>
    %c0_11 = arith.constant 0 : index
    %c192 = arith.constant 192 : index
    %7 = vector.load %arg5[%c0_11, %c192] : memref<16x320xbf16, #tpu.memory_space<vmem>>, vector<16x128xbf16>
    tpu.vector_store %arg5[%c0_11, %c192], %6 {strides = array<i32>} : memref<16x320xbf16, #tpu.memory_space<vmem>>, vector<16x128xbf16>,
    return
  }
  func.func @transform_0(%arg0: i32) -> (i32, i32) {
    %c0_i32 = arith.constant 0 : i32
    %c0_i32_0 = arith.constant 0 : i32
    return %arg0, %c0_i32 : i32, i32
  }
  func.func @transform_1(%arg0: i32) -> (i32, i32) {
    %c0_i32 = arith.constant 0 : i32
    %c0_i32_0 = arith.constant 0 : i32
    return %arg0, %c0_i32 : i32, i32
  }
  func.func @transform_2(%arg0: i32) -> (i32, i32) {
    %c0_i32 = arith.constant 0 : i32
    %c0_i32_0 = arith.constant 0 : i32
    return %arg0, %c0_i32 : i32, i32
  }
  func.func @transform_3(%arg0: i32) -> (i32, i32) {
    %c0_i32 = arith.constant 0 : i32
    %c0_i32_0 = arith.constant 0 : i32
    return %arg0, %c0_i32 : i32, i32
  }
  func.func @transform_4(%arg0: i32) -> (i32, i32) {
    %c0_i32 = arith.constant 0 : i32
    %c0_i32_0 = arith.constant 0 : i32
    return %arg0, %c0_i32 : i32, i32
  }
}

</mosaic_0001>

<bundles_post_ra>
// kernel: tpu_custom_call.1
= control target key start
LH: loop header
LB: loop body
LE: loop exit
PB: predicated region body
PF: predicated region fallthrough
CT: control target
= control target key end

     0   :  { %9 = vsyncpa [#allocation3], 0  ;;  %s358_s0 = inlined_call_operand.hbm [shape: bf16[16,64], index: 0, kind: input, shape index: {}]   ;;  %s359_s1 = inlined_call_operand.hbm [shape: bf16[16,96], index: 1, kind: input, shape index: {}]   ;;  %s360_s2 = inlined_call_operand.hbm [shape: bf16[16,32], index: 2, kind: input, shape index: {}]   ;;  %s361_s3 = inlined_call_operand.vmem [shape: bf16[16,128], index: 3, kind: input, shape index: {}]   ;;  %s362_s4 = inlined_call_operand.hbm [shape: bf16[16,320], index: 4, kind: output, shape index: {}]  }
   0x1   :  { %10 = vsyncpa [#allocation6], 0 }
   0x2   :  { %11 = vsyncpa [#allocation4], 0  ;;  %s236_s15 = smov [#allocation5]   ;;  %s237_s17 = smov [#allocation2]  }
   0x3   :  { %s29_s16 = sshll.u32 %s236_s15, 4  ;;  %s17_s18 = sshll.u32 %s237_s17, 4  ;;  %s30_s16 = int_to_ptr.vmem [resolvable:$true] %s29_s16  ;;  %s270_s18 = int_to_ptr.vmem [resolvable:$true] %s17_s18 }
   0x4   :  { %s142_s21 = scalar_lea.hbm %s359_s1, 128 }
   0x5   :  { %p143_p0 = scmp.ne.s32.totalorder %s359_s1, %s142_s21  ;;  %p146_p1 = scmp.lt.u32.totalorder %s142_s21, %s359_s1 }
   0x7   :  { %p148_p2 = pnand %p146_p1, %p143_p0 }
   0x9   :  { %151 = shalt.err (!%p148_p2)
}
   0xa   :  { %s152_s26 = scalar_lea.vmem %s30_s16, 128  ;;  %p157_p4 = scmp.lt.s32.totalorder %s30_s16, %s30_s16 }
   0xb   :  { %p153_p3 = scmp.ne.s32.totalorder %s30_s16, %s152_s26  ;;  %p158_p5 = scmp.lt.s32.totalorder %s152_s26, %s152_s26 }
   0xd   :  { %p159_p6 = por %p158_p5, %p157_p4 }
   0xf   :  { %p160_p7 = pnand %p159_p6, %p153_p3 }
  0x11   :  { %163 = shalt.err (!%p160_p7)
}
  0x12   :  { %s238_s27 = smov 64   ;;  %s239_s28 = smov 4  }
  0x13   :  { %35 = dma.hbm_to_vmem [thread:$0]  %s359_s1, 128, %s30_s16, [#allocation6], %s238_s27, %s238_s27, %s239_s28  }
  0x14   :  { %s164_s7 = scalar_lea.hbm %s358_s0, 128 }
  0x15   :  { %p165_p8 = scmp.ne.s32.totalorder %s358_s0, %s164_s7  ;;  %p168_p9 = scmp.lt.u32.totalorder %s164_s7, %s358_s0 }
  0x17   :  { %p170_p10 = pnand %p168_p9, %p165_p8 }
  0x19   :  { %173 = shalt.err (!%p170_p10)
}
  0x1a   :  { %s174_s12 = scalar_lea.vmem %s270_s18, 128  ;;  %p179_p12 = scmp.lt.s32.totalorder %s270_s18, %s270_s18 }
  0x1b   :  { %p175_p11 = scmp.ne.s32.totalorder %s270_s18, %s174_s12  ;;  %p180_p13 = scmp.lt.s32.totalorder %s174_s12, %s174_s12 }
  0x1d   :  { %p181_p0 = por %p180_p13, %p179_p12 }
  0x1f   :  { %p182_p1 = pnand %p181_p0, %p175_p11 }
  0x21   :  { %185 = shalt.err (!%p182_p1)
}
  0x22   :  { %23 = dma.hbm_to_vmem [thread:$0]  %s358_s0, 128, %s270_s18, [#allocation3], %s238_s27, %s238_s27, %s239_s28  }
  0x23   :  { %s240_s14 = smov [#allocation7]   ;;  %s186_s19 = scalar_lea.hbm %s360_s2, 128 }
  0x24   :  { %s41_s15 = sshll.u32 %s240_s14, 4  ;;  %p187_p2 = scmp.ne.s32.totalorder %s360_s2, %s186_s19  ;;  %s42_s15 = int_to_ptr.vmem [resolvable:$true] %s41_s15 }
  0x25   :  { %p190_p3 = scmp.lt.u32.totalorder %s186_s19, %s360_s2 }
  0x27   :  { %p192_p4 = pnand %p190_p3, %p187_p2 }
  0x29   :  { %195 = shalt.err (!%p192_p4)
}
  0x2a   :  { %s196_s24 = scalar_lea.vmem %s42_s15, 128  ;;  %p201_p6 = scmp.lt.s32.totalorder %s42_s15, %s42_s15 }
  0x2b   :  { %p197_p5 = scmp.ne.s32.totalorder %s42_s15, %s196_s24  ;;  %p202_p7 = scmp.lt.s32.totalorder %s196_s24, %s196_s24 }
  0x2d   :  { %p203_p8 = por %p202_p7, %p201_p6 }
  0x2f   :  { %p204_p9 = pnand %p203_p8, %p197_p5 }
  0x31   :  { %207 = shalt.err (!%p204_p9)
}
  0x32   :  { %47 = dma.hbm_to_vmem [thread:$0]  %s360_s2, 128, %s42_s15, [#allocation6], %s238_s27, %s238_s27, %s239_s28  }
  0x33   :  { %230 = dma.done.wait [#allocation3], 128  }
  0x34   :  { %231 = vsyncadd [#allocation3], 4294967168 }
  0x35   :  { %232 = dma.done.wait [#allocation6], 256  }
  0x36   :  { %233 = vsyncadd [#allocation6], 4294967040  ;;  %v97_v0 = vld [vmem:[%s361_s3] sm:$0xf]  ;;  %v64_v1 = vld [vmem:[#allocation5] sm:$0xf] }
  0x37   :  { %vm61_vm0 = vcmask 519168   ;;  %101 = vrot.lane.b32.xlu1 %v97_v0, %s238_s27  ;;  %68 = vrot.lane.b32.xlu0 %v64_v1, %s238_s27  ;;  %v98_v2 = vld [vmem:[%s361_s3 + $0x4] sm:$0xf]  ;;  %v65_v3 = vld [vmem:[#allocation5 + $0x4] sm:$0xf]  ;;  %s241_s2 = smov 32  }
  0x38   :  { %v59_v4 = vld [vmem:[#allocation2] sm:$0xf]  ;;  %v60_v5 = vld [vmem:[#allocation2 + $0x4] sm:$0xf]  ;;  %v85_v6 = vld [vmem:[#allocation7 + $0x4] sm:$0xf] }
  0x39   :  { %62 = vst.msk [vmem:[#allocation8] sm:$0xf] %vm61_vm0, %v59_v4  ;;  %63 = vst.msk [vmem:[#allocation8 + $0xc] sm:$0xf] %vm61_vm0, %v60_v5  ;;  %v84_v7 = vld [vmem:[#allocation7] sm:$0xf] }
  0x3a   :  { %vm79_vm1 = vcmask 1043968   ;;  %vm80_vm2 = vcmask 261124   ;;  %vm74_vm3 = vcmask 523264   ;;  %vm111_vm5 = vcmask 523268   ;;  %s242_s3 = smov [#allocation8]  }
  0x3b   :  { %103 = vrot.lane.b32.xlu1 %v98_v2, %s238_s27  ;;  %70 = vrot.lane.b32.xlu0 %v65_v3, %s238_s27  ;;  %vm333_vm4 = vmor %vm80_vm2, %vm79_vm1  ;;  %s120_s27 = sshll.u32 %s242_s3, 4  ;;  %vm94_vm6 = vcmask 519424   ;;  %s121_s27 = int_to_ptr.vmem [resolvable:$true] %s120_s27 }
  0x3c   :  { %vm112_vm7 = vmor %vm111_vm5, %vm79_vm1  ;;  %s208_s28 = scalar_lea.vmem %s121_s27, 384  ;;  %p213_p11 = scmp.lt.s32.totalorder %s121_s27, %s121_s27 }
  0x3d   :  { %p209_p10 = scmp.ne.s32.totalorder %s121_s27, %s208_s28  ;;  %p214_p12 = scmp.lt.s32.totalorder %s208_s28, %s208_s28 }
  0x3f   :  { %90 = vrot.lane.b32.xlu1 %v85_v6, %s241_s2  ;;  %88 = vrot.lane.b32.xlu0 %v84_v7, %s241_s2  ;;  %p215_p13 = por %p214_p12, %p213_p11 }
  0x41   :  { %p216_p0 = pnand %p215_p13, %p209_p10 }
  0xa9   :  { %v102_v8 = vpop.permute.xlu1 %101  ;;  %v69_v9 = vpop.permute.xlu0 %68 }
  0xaa   :  { %v72_v11 = vrot.slane %v69_v9, 4  ;;  %v105_v15 = vrot.slane %v102_v8, 4 }
  0xac   :  { %v75_v12 = vsel %vm74_vm3, %v72_v11, %v69_v9  ;;  %v107_v21 = vsel %vm74_vm3, %v105_v15, %v102_v8 }
  0xad   :  { %82 = vst.msk [vmem:[#allocation8] sm:$0xff] %vm333_vm4, %v75_v12  ;;  %v104_v13 = vpop.permute.xlu1 %103  ;;  %v71_v14 = vpop.permute.xlu0 %70 }
  0xae   :  { %v106_v16 = vrot.slane %v104_v13, 4  ;;  %v73_v17 = vrot.slane %v71_v14, 4 }
  0xb0   :  { %v76_v18 = vsel %vm74_vm3, %v73_v17, %v71_v14  ;;  %v108_v22 = vsel %vm74_vm3, %v106_v16, %v104_v13 }
  0xb1   :  { %83 = vst.msk [vmem:[#allocation8 + $0xc] sm:$0xff] %vm333_vm4, %v76_v18  ;;  %v91_v19 = vpop.permute.xlu1 %90  ;;  %v89_v20 = vpop.permute.xlu0 %88 }
  0xb2   :  { %96 = vst.msk [vmem:[#allocation8 + $0x10] sm:$0xf] %vm94_vm6, %v91_v19  ;;  %95 = vst.msk [vmem:[#allocation8 + $0x4] sm:$0xf] %vm94_vm6, %v89_v20 }
  0xb3   :  { %114 = vst.msk [vmem:[#allocation8 + $0x10] sm:$0xff] %vm112_vm7, %v108_v22  ;;  %113 = vst.msk [vmem:[#allocation8 + $0x4] sm:$0xff] %vm112_vm7, %v107_v21 }
  0xb4   :  { %219 = shalt.err (!%p216_p0)
}
  0xb5   :  { %s220_s7 = scalar_lea.hbm %s362_s4, 384 }
  0xb6   :  { %p221_p1 = scmp.ne.s32.totalorder %s362_s4, %s220_s7  ;;  %p224_p2 = scmp.lt.u32.totalorder %s220_s7, %s362_s4 }
  0xb8   :  { %p226_p3 = pnand %p224_p2, %p221_p1 }
  0xba   :  { %229 = shalt.err (!%p226_p3)
}
  0xbb   :  { %s243_s12 = smov 192   ;;  %s244_s1 = smov 12  }
  0xbc   :  { %126 = dma.vmem_to_hbm [thread:$0]  %s121_s27, 384, %s362_s4, [#allocation4], %s243_s12, %s243_s12, %s244_s1  }
  0xbd   :  { %234 = dma.done.wait [#allocation4], 384  }
  0xbe   :  { %235 = vsyncadd [#allocation4], 4294966912 }
  0xbf   :  { %130 = vsyncpa [#allocation3], 1 }
  0xc0   :  { %131 = vsyncpa [#allocation6], 1 }
  0xc1   :  { %132 = vsyncpa [#allocation4], 1 }

</bundles_post_ra>
